<compile_context>
chip_gen: v7x
topology: tpu7x:2x2x1
jax: 0.10.0
libtpu: 0.0.40
codegen_flags: <defaults>
</compile_context>

<pallas_src>
import functools
import math

import jax
import jax.numpy as jnp
from jax.experimental import pallas as pl
from jax.experimental.pallas import tpu as pltpu


def _round_up(v, m):
    return (v + m - 1) // m * m


def _pad_to(a, shape):
    pads = [(0, s - d) for d, s in zip(a.shape, shape)]
    if all(p == (0, 0) for p in pads):
        return a
    return jnp.pad(a, pads)


def _cfc_kernel(basis_ref, s_ref, o_ref, acc_ref):
    # basis_ref: (tm, tk)   row/contraction tile of the stacked basis
    # s_ref    : (tk, Hp)   contraction tile of the pre-scaled RHS
    # o_ref    : (tm, Hp)   written once, at the last contraction step
    # acc_ref  : (tm, Hp)   f32 accumulator scratch (persists across k steps)
    @pl.when(pl.program_id(1) == 0)
    def _():
        acc_ref[...] = jnp.zeros_like(acc_ref)

    # Plain `+=` so Mosaic can keep the result in the MXU result buffer
    # across k-steps on v7x (MRB in-place accumulate).
    acc_ref[...] += jnp.dot(basis_ref[...], s_ref[...],
                            preferred_element_type=jnp.float32)

    @pl.when(pl.program_id(1) == pl.num_programs(1) - 1)
    def _():
        o_ref[...] = acc_ref[...].astype(o_ref.dtype)


def _pick_tm(np_):
    """Output-row tile: large when it divides cleanly, smaller to cap padding."""
    if np_ <= 256:
        return np_
    for cand in (256, 128, 64, 32):
        if _round_up(np_, cand) - np_ <= max(np_ // 16, cand // 4):
            return cand
    return 16


@functools.partial(jax.jit, static_argnames=("mxu_dtype",))
def correlation_free_conv(filter_parm, filter_basis, x, *, mxu_dtype=jnp.bfloat16):
    """y = sum_k filter_basis[k] @ (filter_parm[k] * x)  -- Pallas TPU forward."""
    kp1, h = filter_parm.shape
    _, n, _ = filter_basis.shape
    assert filter_basis.shape == (kp1, n, n)
    assert x.shape == (n, h)

    itemsize = jnp.dtype(mxu_dtype).itemsize
    hp = _round_up(h, 128)            # lane-dense output (unmasked vst)
    np_ = _round_up(n, 16)            # safe sublane tiles for f32 and bf16
    tm = _pick_tm(np_)                # output-row tile ("parallel" axis)
    npad_m = _round_up(np_, tm)

    # Contraction tiling ("arbitrary" trailing axis), sized from a VMEM budget
    # that fits every generation (v7x 64 MiB physical is the binding one).
    ct = kp1 * np_
    budget = 36 * 1024 * 1024
    fixed = 3 * tm * hp * 4                      # 2x out buffers + f32 accumulator
    per_tk = 2 * (tm + hp) * itemsize            # double-buffered basis + S per row
    tk_max = max(256, (budget - fixed) // per_tk // 256 * 256)
    n_k = max(1, math.ceil(ct / tk_max))
    tk = _round_up(math.ceil(ct / n_k), 256)
    ctp = tk * n_k

    need = 2 * tm * tk * itemsize + 2 * tk * hp * itemsize + fixed
    vmem_limit = int(min(max(2 * need, 16 << 20), 48 << 20))

    f32 = jnp.float32
    theta32 = filter_parm.astype(f32)
    x32 = x.astype(f32)

    # S[k*Np + m, h] = theta[k, h] * x[m, h] — computed ONCE in the wrapper
    # (one fused XLA op), streamed in mxu_dtype; never rebuilt per grid step.
    s = theta32[:, None, :] * x32[None, :, :]                    # (K+1, N, H)
    s = _pad_to(s, (kp1, np_, hp)).reshape(kp1 * np_, hp)
    s = _pad_to(s, (ctp, hp)).astype(mxu_dtype)

    # B2[n, k*Np + m] = basis[k, n, m] — layout plumbing only, done once;
    # streamed from HBM already in mxu_dtype (halves the dominant traffic).
    basis_p = _pad_to(filter_basis.astype(f32), (kp1, npad_m, np_))
    basis2 = jnp.transpose(basis_p, (1, 0, 2)).reshape(npad_m, kp1 * np_)
    basis2 = _pad_to(basis2, (npad_m, ctp)).astype(mxu_dtype)

    y_p = pl.pallas_call(
        _cfc_kernel,
        out_shape=jax.ShapeDtypeStruct((npad_m, hp), jnp.float32),
        grid=(npad_m // tm, ctp // tk),
        in_specs=[
            pl.BlockSpec((tm, tk), lambda i, k: (i, k)),   # stacked-basis tile
            pl.BlockSpec((tk, hp), lambda i, k: (k, 0)),   # pre-scaled RHS tile
        ],
        out_specs=pl.BlockSpec((tm, hp), lambda i, k: (i, 0)),
        scratch_shapes=[pltpu.VMEM((tm, hp), jnp.float32)],
        compiler_params=pltpu.CompilerParams(
            dimension_semantics=("parallel", "arbitrary"),
            vmem_limit_bytes=vmem_limit,
        ),
    )(basis2, s)

    # TODO(synk): batch multiple x matrices along H (RHS -> ((K+1)*N, B*Hp)) to
    # fill the 256-wide MXU on v6e/v7x and amortize the basis HBM reads.
    return y_p[:n, :h].astype(x.dtype)


def _reference(filter_parm, filter_basis, x):
    # Mirrors the PyTorch forward exactly.
    filter_x = filter_parm[:, None, :] * x[None, :, :]          # (K+1, N, H)
    y = jnp.einsum("knm,kmh->knh", filter_basis, filter_x)      # (K+1, N, H)
    return y.sum(axis=0)                                        # (N, H)


if __name__ == "__main__":
    k = 3            # polynomial order -> K+1 = 4 basis matrices
    hidden_dim = 32
    num_nodes = 16

    key = jax.random.PRNGKey(0)
    k_parm, k_basis, k_x = jax.random.split(key, 3)

    # Deterministic xavier_normal_-style init for filter_parm.
    std = (2.0 / (hidden_dim + (k + 1))) ** 0.5
    filter_parm = std * jax.random.normal(k_parm, (k + 1, hidden_dim), jnp.float32)

    filter_basis = jax.random.normal(k_basis, (k + 1, num_nodes, num_nodes), jnp.float32)
    x = jax.random.normal(k_x, (num_nodes, hidden_dim), jnp.float32)

    y_ref = _reference(filter_parm, filter_basis, x)

    # Exact path: f32 MXU operands, tight check vs reference.
    y_f32 = jax.block_until_ready(
        correlation_free_conv(filter_parm, filter_basis, x, mxu_dtype=jnp.float32))
    assert y_f32.shape == (num_nodes, hidden_dim)
    assert jnp.allclose(y_f32, y_ref, atol=1e-4, rtol=1e-4), "f32 mismatch vs reference"

    # Fast path (default): bf16 operands in HBM, f32 accumulation — relaxed check.
    y_fast = jax.block_until_ready(correlation_free_conv(filter_parm, filter_basis, x))
    assert y_fast.shape == (num_nodes, hidden_dim)
    assert jnp.allclose(y_fast, y_ref, atol=5e-2, rtol=5e-2), "bf16 mismatch vs reference"

    print("KERNEL_OK")
</pallas_src>

<mosaic_0001>
module attributes {stable_mosaic.version = 11 : i64} {
  func.func @_cfc_kernel(%arg0: i32, %arg1: i32, %arg2: memref<16x256xf32, #tpu.memory_space<vmem>>, %arg3: memref<256x128xf32, #tpu.memory_space<vmem>>, %arg4: memref<16x128xf32, #tpu.memory_space<vmem>>, %arg5: memref<16x128xf32, #tpu.memory_space<vmem>>) attributes {dimension_semantics = [#tpu.dimension_semantics<parallel>, #tpu.dimension_semantics<arbitrary>], iteration_bounds = array<i64: 1, 1>, scalar_prefetch = 0 : i64, scratch_operands = 1 : i64, tpu.core_type = #tpu.core_type<tc>, window_params = [{transform_indices = @transform_0, window_bounds = array<i64: 16, 256>}, {transform_indices = @transform_1, window_bounds = array<i64: 256, 128>}, {transform_indices = @transform_2, window_bounds = array<i64: 16, 128>}]} {
    %c0_i32 = arith.constant 0 : i32
    %0 = arith.cmpi eq, %arg1, %c0_i32 : i32
    %1 = arith.extui %0 : i1 to i32
    %c0_i32_0 = arith.constant 0 : i32
    %2 = arith.cmpi ne, %1, %c0_i32_0 : i32
    scf.if %2 {
      %cst_10 = arith.constant 0.000000e+00 : f32
      %12 = vector.broadcast %cst_10 : f32 to vector<16x128xf32>
      %c0_11 = arith.constant 0 : index
      %c0_12 = arith.constant 0 : index
      %13 = vector.load %arg5[%c0_11, %c0_12] : memref<16x128xf32, #tpu.memory_space<vmem>>, vector<16x128xf32>
      tpu.vector_store %arg5[%c0_11, %c0_12], %12 {strides = array<i32>} : memref<16x128xf32, #tpu.memory_space<vmem>>, vector<16x128xf32>,
    } else {
    }
    %c0 = arith.constant 0 : index
    %c0_1 = arith.constant 0 : index
    %3 = vector.load %arg5[%c0, %c0_1] : memref<16x128xf32, #tpu.memory_space<vmem>>, vector<16x128xf32>
    %c0_2 = arith.constant 0 : index
    %c0_3 = arith.constant 0 : index
    %4 = vector.load %arg2[%c0_2, %c0_3] : memref<16x256xf32, #tpu.memory_space<vmem>>, vector<16x256xf32>
    %c0_4 = arith.constant 0 : index
    %c0_5 = arith.constant 0 : index
    %5 = vector.load %arg3[%c0_4, %c0_5] : memref<256x128xf32, #tpu.memory_space<vmem>>, vector<256x128xf32>
    %cst = arith.constant dense<0.000000e+00> : vector<16x128xf32>
    %6 = tpu.matmul %4, %5, %cst {dimension_numbers = #tpu.dot_dimension_numbers<[1], [0], [0], [1], [0, 0, 1, 1], [], []>} : vector<16x256xf32>, vector<256x128xf32>, vector<16x128xf32> -> vector<16x128xf32>
    %7 = arith.addf %3, %6 : vector<16x128xf32>
    %c0_6 = arith.constant 0 : index
    %c0_7 = arith.constant 0 : index
    %8 = vector.load %arg5[%c0_6, %c0_7] : memref<16x128xf32, #tpu.memory_space<vmem>>, vector<16x128xf32>
    tpu.vector_store %arg5[%c0_6, %c0_7], %7 {strides = array<i32>} : memref<16x128xf32, #tpu.memory_space<vmem>>, vector<16x128xf32>,
    %c0_i32_8 = arith.constant 0 : i32
    %9 = arith.cmpi eq, %arg1, %c0_i32_8 : i32
    %10 = arith.extui %9 : i1 to i32
    %c0_i32_9 = arith.constant 0 : i32
    %11 = arith.cmpi ne, %10, %c0_i32_9 : i32
    scf.if %11 {
      %c0_10 = arith.constant 0 : index
      %c0_11 = arith.constant 0 : index
      %12 = vector.load %arg5[%c0_10, %c0_11] : memref<16x128xf32, #tpu.memory_space<vmem>>, vector<16x128xf32>
      %c0_12 = arith.constant 0 : index
      %c0_13 = arith.constant 0 : index
      %13 = vector.load %arg4[%c0_12, %c0_13] : memref<16x128xf32, #tpu.memory_space<vmem>>, vector<16x128xf32>
      tpu.vector_store %arg4[%c0_12, %c0_13], %12 {strides = array<i32>} : memref<16x128xf32, #tpu.memory_space<vmem>>, vector<16x128xf32>,
    } else {
    }
    return
  }
  func.func @transform_0(%arg0: i32, %arg1: i32) -> (i32, i32) {
    %c0_i32 = arith.constant 0 : i32
    return %arg0, %arg1 : i32, i32
  }
  func.func @transform_1(%arg0: i32, %arg1: i32) -> (i32, i32) {
    %c0_i32 = arith.constant 0 : i32
    %c0_i32_0 = arith.constant 0 : i32
    return %arg1, %c0_i32 : i32, i32
  }
  func.func @transform_2(%arg0: i32, %arg1: i32) -> (i32, i32) {
    %c0_i32 = arith.constant 0 : i32
    %c0_i32_0 = arith.constant 0 : i32
    return %arg0, %c0_i32 : i32, i32
  }
}

</mosaic_0001>

<bundles_post_ra>
// kernel: correlation_free_conv.1
= control target key start
LH: loop header
LB: loop body
LE: loop exit
PB: predicated region body
PF: predicated region fallthrough
CT: control target
= control target key end

     0   :  { %s409_s0 = inlined_call_operand.vmem [shape: f32[16,256], index: 0, kind: input, shape index: {}]   ;;  %s410_s1 = inlined_call_operand.vmem [shape: f32[256,128], index: 1, kind: input, shape index: {}]   ;;  %s411_s2 = inlined_call_operand.hbm [shape: f32[16,128], index: 2, kind: output, shape index: {}]  }
   0x1   :  { %v40_v0 = vld [vmem:[%s410_s1 + $0x80] sm:$0xff]  ;;  %v41_v1 = vld [vmem:[%s410_s1 + $0x88] sm:$0xff]  ;;  %v42_v5 = vld [vmem:[%s410_s1 + $0x90] sm:$0xff] }
   0x2   :  { %v24_v2 = vld [vmem:[%s410_s1] sm:$0xff]  ;;  %v196_v3 = vpack.c.bf16 %v41_v1, %v40_v0  ;;  %v25_v4 = vld [vmem:[%s410_s1 + $0x8] sm:$0xff]  ;;  %v43_v6 = vld [vmem:[%s410_s1 + $0x98] sm:$0xff] }
   0x3   :  { %v198_v7 = vpack.c.bf16 %v25_v4, %v24_v2  ;;  %v200_v8 = vpack.c.bf16 %v43_v6, %v42_v5  ;;  %v26_v9 = vld [vmem:[%s410_s1 + $0x10] sm:$0xff]  ;;  %v27_v10 = vld [vmem:[%s410_s1 + $0x18] sm:$0xff]  ;;  %v44_v11 = vld [vmem:[%s410_s1 + $0xa0] sm:$0xff] }
   0x4   :  { %197 = vmatprep.subr.bf16.mxu0 %v196_v3  ;;  %228 = vmatprep.subr.bf16.mxu1 %v196_v3  ;;  %v45_v12 = vld [vmem:[%s410_s1 + $0xa8] sm:$0xff]  ;;  %v202_v13 = vpack.c.bf16 %v27_v10, %v26_v9  ;;  %v28_v15 = vld [vmem:[%s410_s1 + $0x20] sm:$0xff]  ;;  %v46_v17 = vld [vmem:[%s410_s1 + $0xb0] sm:$0xff] }
   0x5   :  { %199 = vmatpush3.bf16.msra.mxu0 %v198_v7  ;;  %236 = vmatpush3.bf16.msra.mxu1 %v198_v7  ;;  %v204_v14 = vpack.c.bf16 %v45_v12, %v44_v11  ;;  %v29_v16 = vld [vmem:[%s410_s1 + $0x28] sm:$0xff]  ;;  %v47_v18 = vld [vmem:[%s410_s1 + $0xb8] sm:$0xff]  ;;  %v30_v21 = vld [vmem:[%s410_s1 + $0x30] sm:$0xff] }
   0x6   :  { %201 = vmatprep.subr.bf16.mxu0 %v200_v8  ;;  %229 = vmatprep.subr.bf16.mxu1 %v200_v8  ;;  %v206_v19 = vpack.c.bf16 %v29_v16, %v28_v15  ;;  %v208_v20 = vpack.c.bf16 %v47_v18, %v46_v17  ;;  %v31_v22 = vld [vmem:[%s410_s1 + $0x38] sm:$0xff]  ;;  %v48_v23 = vld [vmem:[%s410_s1 + $0xc0] sm:$0xff]  ;;  %v49_v24 = vld [vmem:[%s410_s1 + $0xc8] sm:$0xff] }
   0x7   :  { %v21_v25 = vld [vmem:[%s409_s0 + $0x8] sm:$0xff]  ;;  %v23_v26 = vld [vmem:[%s409_s0 + $0x18] sm:$0xff]  ;;  %v210_v27 = vpack.c.bf16 %v31_v22, %v30_v21 }
   0x8   :  { %120 = vmatprep.mubr.f32.mxu0 %v21_v25 }
   0x9   :  { %203 = vmatpush3.bf16.msra.mxu0 %v202_v13  ;;  %237 = vmatpush3.bf16.msra.mxu1 %v202_v13 }
   0xa   :  { %205 = vmatprep.subr.bf16.mxu0 %v204_v14  ;;  %230 = vmatprep.subr.bf16.mxu1 %v204_v14 }
   0xd   :  { %207 = vmatpush3.bf16.msra.mxu0 %v206_v19  ;;  %238 = vmatpush3.bf16.msra.mxu1 %v206_v19 }
   0xe   :  { %7 = vsyncpa [#allocation4], 0  ;;  %209 = vmatprep.subr.bf16.mxu0 %v208_v20  ;;  %231 = vmatprep.subr.bf16.mxu1 %v208_v20  ;;  %v212_v28 = vpack.c.bf16 %v49_v24, %v48_v23  ;;  %v32_v29 = vld [vmem:[%s410_s1 + $0x40] sm:$0xff]  ;;  %v33_v30 = vld [vmem:[%s410_s1 + $0x48] sm:$0xff]  ;;  %s271_s25 = smov [#allocation3]  }
   0xf   :  { %v50_v31 = vld [vmem:[%s410_s1 + $0xd0] sm:$0xff]  ;;  %v51_v32 = vld [vmem:[%s410_s1 + $0xd8] sm:$0xff]  ;;  %125 = vmatprep.mubr.f32.mxu1 %v23_v26  ;;  %v214_v33 = vpack.c.bf16 %v33_v30, %v32_v29  ;;  %v52_v37 = vld [vmem:[%s410_s1 + $0xe0] sm:$0xff]  ;;  %s147_s26 = sshll.u32 %s271_s25, 4  ;;  %s148_s26 = int_to_ptr.vmem [resolvable:$true] %s147_s26 }
  0x10   :  { %v216_v34 = vpack.c.bf16 %v51_v32, %v50_v31  ;;  %v34_v35 = vld [vmem:[%s410_s1 + $0x50] sm:$0xff]  ;;  %v35_v36 = vld [vmem:[%s410_s1 + $0x58] sm:$0xff]  ;;  %v53_v38 = vld [vmem:[%s410_s1 + $0xe8] sm:$0xff]  ;;  %p252_p1 = scmp.lt.s32.totalorder %s148_s26, %s148_s26 }
  0x11   :  { %211 = vmatpush3.bf16.msra.mxu0 %v210_v27  ;;  %239 = vmatpush3.bf16.msra.mxu1 %v210_v27  ;;  %v218_v39 = vpack.c.bf16 %v35_v36, %v34_v35  ;;  %v220_v40 = vpack.c.bf16 %v53_v38, %v52_v37  ;;  %v36_v41 = vld [vmem:[%s410_s1 + $0x60] sm:$0xff]  ;;  %v37_v42 = vld [vmem:[%s410_s1 + $0x68] sm:$0xff]  ;;  %v54_v43 = vld [vmem:[%s410_s1 + $0xf0] sm:$0xff] }
  0x12   :  { %213 = vmatprep.subr.bf16.mxu0 %v212_v28  ;;  %232 = vmatprep.subr.bf16.mxu1 %v212_v28  ;;  %v55_v44 = vld [vmem:[%s410_s1 + $0xf8] sm:$0xff]  ;;  %v222_v45 = vpack.c.bf16 %v37_v42, %v36_v41  ;;  %v38_v47 = vld [vmem:[%s410_s1 + $0x70] sm:$0xff]  ;;  %v20_v50 = vld [vmem:[%s409_s0] sm:$0xff] }
  0x13   :  { %v224_v46 = vpack.c.bf16 %v55_v44, %v54_v43  ;;  %v39_v48 = vld [vmem:[%s410_s1 + $0x78] sm:$0xff]  ;;  %v22_v51 = vld [vmem:[%s409_s0 + $0x10] sm:$0xff]  ;;  %s247_s1 = scalar_lea.vmem %s148_s26, 256 }
  0x14   :  { %v226_v49 = vpack.c.bf16 %v39_v48, %v38_v47  ;;  %p248_p0 = scmp.ne.s32.totalorder %s148_s26, %s247_s1  ;;  %p253_p2 = scmp.lt.s32.totalorder %s247_s1, %s247_s1 }
  0x15   :  { %215 = vmatpush3.bf16.msra.mxu0 %v214_v33  ;;  %240 = vmatpush3.bf16.msra.mxu1 %v214_v33 }
  0x16   :  { %217 = vmatprep.subr.bf16.mxu0 %v216_v34  ;;  %233 = vmatprep.subr.bf16.mxu1 %v216_v34  ;;  %p254_p3 = por %p253_p2, %p252_p1 }
  0x18   :  { %p255_p4 = pnand %p254_p3, %p248_p0 }
  0x19   :  { %219 = vmatpush3.bf16.msra.mxu0 %v218_v39  ;;  %241 = vmatpush3.bf16.msra.mxu1 %v218_v39 }
  0x1a   :  { %221 = vmatprep.subr.bf16.mxu0 %v220_v40  ;;  %234 = vmatprep.subr.bf16.mxu1 %v220_v40 }
  0x1d   :  { %223 = vmatpush3.bf16.msra.mxu0 %v222_v45  ;;  %242 = vmatpush3.bf16.msra.mxu1 %v222_v45 }
  0x1e   :  { %225 = vmatprep.subr.bf16.mxu0 %v224_v46  ;;  %235 = vmatprep.subr.bf16.mxu1 %v224_v46 }
  0x21   :  { %227 = vmatpush3.bf16.msra.mxu0 %v226_v49  ;;  %243 = vmatpush3.bf16.msra.mxu1 %v226_v49 }
  0x24   :  { %121 = vmatmul.mubr.f32.vlgmr.msra.gmra.mrb[0].mxu0 %v20_v50  ;;  %126 = vmatmul.mubr.f32.vlgmr.msra.gmra.mrb[0].mxu1 %v22_v51 }
  0xf7   :  { %v190_v52 = vpop.f32.mrb[0].mxu0  ;;  %v193_v53 = vpop.f32.mrb[0].mxu1 }
  0xf8   :  { %v191_v54 = vpop.f32.mrb[1].mxu0  ;;  %v194_v55 = vpop.f32.mrb[1].mxu1 }
  0xf9   :  { %v192_v56 = vadd.f32 %v191_v54, %v190_v52  ;;  %v195_v57 = vadd.f32 %v194_v55, %v193_v53 }
  0xfb   :  { %140 = vst [vmem:[#allocation3] sm:$0xff] %v192_v56  ;;  %141 = vst [vmem:[#allocation3 + $0x8] sm:$0xff] %v195_v57 }
  0xfc   :  { %258 = shalt.err (!%p255_p4)
}
  0xfd   :  { %s259_s28 = scalar_lea.hbm %s411_s2, 256 }
  0xfe   :  { %p260_p5 = scmp.ne.s32.totalorder %s411_s2, %s259_s28  ;;  %p263_p6 = scmp.lt.u32.totalorder %s259_s28, %s411_s2 }
 0x100   :  { %p265_p7 = pnand %p263_p6, %p260_p5 }
 0x102   :  { %268 = shalt.err (!%p265_p7)
}
 0x103   :  { %s272_s5 = smov 128   ;;  %s273_s6 = smov 8  }
 0x104   :  { %153 = dma.vmem_to_hbm [thread:$0]  %s148_s26, 256, %s411_s2, [#allocation4], %s272_s5, %s272_s5, %s273_s6  }
 0x105   :  { %269 = dma.done.wait [#allocation4], 256  }
 0x106   :  { %270 = vsyncadd [#allocation4], 4294967040 }
 0x107   :  { %157 = vsyncpa [#allocation4], 1 }

</bundles_post_ra>
